<compile_context>
chip_gen: v7x
topology: tpu7x:2x2x1
jax: 0.10.0
libtpu: 0.0.40
codegen_flags: <defaults>
</compile_context>

<pallas_src>
import jax
import jax.numpy as jnp
from jax.experimental import pallas as pl
from jax.experimental.pallas import tpu as pltpu


def critic_kernel(x_ref, w1_ref, b1_ref, w2_ref, b2_ref, w3_ref, b3_ref, out_ref):
    # fc1 + ReLU  (MXU, f32 accumulate; bias/ReLU in f32)
    h1 = jnp.dot(x_ref[...], w1_ref[...], preferred_element_type=jnp.float32)
    h1 = jnp.maximum(h1 + b1_ref[...], 0.0)

    # fc2 + ReLU  (cast the MXU input only; elementwise math stays f32)
    h1 = h1.astype(w2_ref.dtype)
    h2 = jnp.dot(h1, w2_ref[...], preferred_element_type=jnp.float32)
    h2 = jnp.maximum(h2 + b2_ref[...], 0.0)

    # fc3 (out_features == 1): VPU multiply + XLU lane reduce instead of an
    # MXU pass that would use a single result column.
    v = jnp.sum(h2 * w3_ref[...], axis=-1, keepdims=True)   # [tile_b, 1] f32

    # scalar bias from SMEM
    out_ref[...] = v + b3_ref[0]


def critic_forward(x, params, *, tile_b=None, use_bf16=False):
    """x: [B, state_size] float32 -> value: [B, 1] float32.

    params = (w1, b1, w2, b2, w3, b3) with wk of shape (in, out),
    bk of shape (1, out) except b3 of shape (1,).
    """
    w1, b1, w2, b2, w3, b3 = params
    B, S = x.shape
    H0 = w1.shape[1]
    H1 = w2.shape[1]

    if tile_b is None:
        # Bounded tile: good MXU row occupancy, bounded VMEM, and >=2 grid
        # steps once B >= 512 so both v7x TensorCores get work.
        tile_b = min(256, B)
    assert B % tile_b == 0, "batch must be divisible by tile_b"
    assert tile_b == B or tile_b % 8 == 0, "tile_b must be a multiple of 8 (f32)"
    if use_bf16:
        assert tile_b == B or tile_b % 16 == 0, "tile_b must be a multiple of 16 for bf16"

    grid = (B // tile_b,)

    # Optional bf16 cast of MXU inputs only (weights + activations feeding the
    # dots).  Biases, the fc3 row, and all post-dot math remain f32.
    if use_bf16:
        x_in = x.astype(jnp.bfloat16)
        w1c = w1.astype(jnp.bfloat16)
        w2c = w2.astype(jnp.bfloat16)
    else:
        x_in, w1c, w2c = x, w1, w2

    w3_row = w3.reshape(1, H1).astype(jnp.float32)   # (H1, 1) -> (1, H1) row
    b3_s = b3.reshape(1).astype(jnp.float32)          # scalar bias -> SMEM

    flops = 2 * B * (S * H0 + H0 * H1 + H1)
    bytes_accessed = (
        x_in.size * x_in.dtype.itemsize
        + w1c.size * w1c.dtype.itemsize + b1.size * b1.dtype.itemsize
        + w2c.size * w2c.dtype.itemsize + b2.size * b2.dtype.itemsize
        + w3_row.size * 4 + b3_s.size * 4
        + B * 1 * 4
    )

    return pl.pallas_call(
        critic_kernel,
        out_shape=jax.ShapeDtypeStruct((B, 1), jnp.float32),
        grid_spec=pltpu.PrefetchScalarGridSpec(
            num_scalar_prefetch=0,
            grid=grid,
            in_specs=[
                pl.BlockSpec((tile_b, S), lambda i: (i, 0)),    # x tile
                pl.BlockSpec((S, H0), lambda i: (0, 0)),        # w1 (resident)
                pl.BlockSpec((1, H0), lambda i: (0, 0)),        # b1
                pl.BlockSpec((H0, H1), lambda i: (0, 0)),       # w2 (resident)
                pl.BlockSpec((1, H1), lambda i: (0, 0)),        # b2
                pl.BlockSpec((1, H1), lambda i: (0, 0)),        # w3 as a lane row
                pl.BlockSpec(memory_space=pltpu.MemorySpace.SMEM),  # b3 scalar
            ],
            out_specs=pl.BlockSpec((tile_b, 1), lambda i: (i, 0)),
        ),
        compiler_params=pltpu.CompilerParams(
            dimension_semantics=("parallel",),
        ),
        cost_estimate=pl.CostEstimate(
            flops=flops, transcendentals=0, bytes_accessed=bytes_accessed
        ),
    )(x_in, w1c, b1, w2c, b2, w3_row, b3_s)


def init_critic_params(key, state_size, hidden_0=256, hidden_1=128):
    """Deterministic orthogonal weights (gain=1.0), zero biases — mirrors
    initialize_fc_layer. Weights stored as (in, out)."""
    k1, k2, k3 = jax.random.split(key, 3)
    orth = jax.nn.initializers.orthogonal(scale=1.0)
    w1 = orth(k1, (state_size, hidden_0), jnp.float32)
    b1 = jnp.zeros((1, hidden_0), jnp.float32)
    w2 = orth(k2, (hidden_0, hidden_1), jnp.float32)
    b2 = jnp.zeros((1, hidden_1), jnp.float32)
    w3 = orth(k3, (hidden_1, 1), jnp.float32)
    b3 = jnp.zeros((1,), jnp.float32)
    return (w1, b1, w2, b2, w3, b3)


def critic_forward_ref(x, params):
    """Pure-JAX reference for correctness checking."""
    w1, b1, w2, b2, w3, b3 = params
    h1 = jnp.maximum(x @ w1 + b1, 0.0)
    h2 = jnp.maximum(h1 @ w2 + b2, 0.0)
    return h2 @ w3 + b3


if __name__ == "__main__":
    key = jax.random.PRNGKey(0)
    k_x, k_p = jax.random.split(key)

    batch = 8
    state_size = 32       # small, consistent with an MLP critic over a state vector
    hidden_0, hidden_1 = 256, 128

    x = jax.random.normal(k_x, (batch, state_size), dtype=jnp.float32)
    params = init_critic_params(k_p, state_size, hidden_0, hidden_1)

    ref = critic_forward_ref(x, params)

    # f32 path (exact match expected)
    value = critic_forward(x, params)
    value = jax.block_until_ready(value)
    assert value.shape == (batch, 1)
    assert jnp.allclose(value, ref, atol=1e-4, rtol=1e-4)

    # bf16 MXU-input path (v6e/v7x fast path; loose tolerance vs f32 reference)
    value_bf16 = critic_forward(x, params, use_bf16=True)
    value_bf16 = jax.block_until_ready(value_bf16)
    assert value_bf16.shape == (batch, 1)
    assert jnp.allclose(value_bf16, ref, atol=1e-1, rtol=1e-1)

    print("KERNEL_OK")
</pallas_src>

<mosaic_0001>
module attributes {stable_mosaic.version = 11 : i64} {
  func.func @critic_kernel(%arg0: i32, %arg1: memref<8x32xf32, #tpu.memory_space<vmem>>, %arg2: memref<32x256xf32, #tpu.memory_space<vmem>>, %arg3: memref<1x256xf32, #tpu.memory_space<vmem>>, %arg4: memref<256x128xf32, #tpu.memory_space<vmem>>, %arg5: memref<1x128xf32, #tpu.memory_space<vmem>>, %arg6: memref<1x128xf32, #tpu.memory_space<vmem>>, %arg7: memref<1xf32, #tpu.memory_space<smem>>, %arg8: memref<8x1xf32, #tpu.memory_space<vmem>>) attributes {dimension_semantics = [#tpu.dimension_semantics<parallel>], iteration_bounds = array<i64: 1>, scalar_prefetch = 0 : i64, scratch_operands = 0 : i64, tpu.core_type = #tpu.core_type<tc>, window_params = [{transform_indices = @transform_0, window_bounds = array<i64: 8, 32>}, {pipeline_mode = #tpu.pipeline_mode<synchronous>, transform_indices = @transform_1, window_bounds = array<i64: 32, 256>}, {pipeline_mode = #tpu.pipeline_mode<synchronous>, transform_indices = @transform_2, window_bounds = array<i64: 1, 256>}, {pipeline_mode = #tpu.pipeline_mode<synchronous>, transform_indices = @transform_3, window_bounds = array<i64: 256, 128>}, {pipeline_mode = #tpu.pipeline_mode<synchronous>, transform_indices = @transform_4, window_bounds = array<i64: 1, 128>}, {pipeline_mode = #tpu.pipeline_mode<synchronous>, transform_indices = @transform_5, window_bounds = array<i64: 1, 128>}, {transform_indices = @transform_6, window_bounds = array<i64: 1>}, {transform_indices = @transform_7, window_bounds = array<i64: 8, 1>}]} {
    %c0 = arith.constant 0 : index
    %c0_0 = arith.constant 0 : index
    %0 = vector.load %arg1[%c0, %c0_0] : memref<8x32xf32, #tpu.memory_space<vmem>>, vector<8x32xf32>
    %c0_1 = arith.constant 0 : index
    %c0_2 = arith.constant 0 : index
    %1 = vector.load %arg2[%c0_1, %c0_2] : memref<32x256xf32, #tpu.memory_space<vmem>>, vector<32x256xf32>
    %cst = arith.constant dense<0.000000e+00> : vector<8x256xf32>
    %2 = tpu.matmul %0, %1, %cst {dimension_numbers = #tpu.dot_dimension_numbers<[1], [0], [0], [1], [0, 0, 1, 1], [], []>} : vector<8x32xf32>, vector<32x256xf32>, vector<8x256xf32> -> vector<8x256xf32>
    %c0_3 = arith.constant 0 : index
    %c0_4 = arith.constant 0 : index
    %3 = vector.load %arg3[%c0_3, %c0_4] : memref<1x256xf32, #tpu.memory_space<vmem>>, vector<1x256xf32>
    %4 = vector.broadcast %3 : vector<1x256xf32> to vector<8x256xf32>
    %5 = arith.addf %2, %4 : vector<8x256xf32>
    %cst_5 = arith.constant 0.000000e+00 : f32
    %6 = vector.broadcast %cst_5 : f32 to vector<8x256xf32>
    %7 = arith.maximumf %5, %6 : vector<8x256xf32>
    %c0_6 = arith.constant 0 : index
    %c0_7 = arith.constant 0 : index
    %8 = vector.load %arg4[%c0_6, %c0_7] : memref<256x128xf32, #tpu.memory_space<vmem>>, vector<256x128xf32>
    %cst_8 = arith.constant dense<0.000000e+00> : vector<8x128xf32>
    %9 = tpu.matmul %7, %8, %cst_8 {dimension_numbers = #tpu.dot_dimension_numbers<[1], [0], [0], [1], [0, 0, 1, 1], [], []>} : vector<8x256xf32>, vector<256x128xf32>, vector<8x128xf32> -> vector<8x128xf32>
    %c0_9 = arith.constant 0 : index
    %c0_10 = arith.constant 0 : index
    %10 = vector.load %arg5[%c0_9, %c0_10] : memref<1x128xf32, #tpu.memory_space<vmem>>, vector<1x128xf32>
    %11 = vector.broadcast %10 : vector<1x128xf32> to vector<8x128xf32>
    %12 = arith.addf %9, %11 : vector<8x128xf32>
    %cst_11 = arith.constant 0.000000e+00 : f32
    %13 = vector.broadcast %cst_11 : f32 to vector<8x128xf32>
    %14 = arith.maximumf %12, %13 : vector<8x128xf32>
    %c0_12 = arith.constant 0 : index
    %c0_13 = arith.constant 0 : index
    %15 = vector.load %arg6[%c0_12, %c0_13] : memref<1x128xf32, #tpu.memory_space<vmem>>, vector<1x128xf32>
    %16 = vector.broadcast %15 : vector<1x128xf32> to vector<8x128xf32>
    %17 = arith.mulf %14, %16 : vector<8x128xf32>
    %cst_14 = arith.constant dense<0.000000e+00> : vector<8xf32>
    %18 = vector.multi_reduction <add>, %17, %cst_14 [1] : vector<8x128xf32> to vector<8xf32>
    %19 = vector.shape_cast %18 : vector<8xf32> to vector<8x1xf32>
    %c0_15 = arith.constant 0 : index
    %20 = memref.load %arg7[%c0_15] : memref<1xf32, #tpu.memory_space<smem>>
    %21 = vector.broadcast %20 : f32 to vector<8x1xf32>
    %22 = arith.addf %19, %21 : vector<8x1xf32>
    %c0_16 = arith.constant 0 : index
    %c0_17 = arith.constant 0 : index
    %23 = vector.load %arg8[%c0_16, %c0_17] : memref<8x1xf32, #tpu.memory_space<vmem>>, vector<8x1xf32>
    tpu.vector_store %arg8[%c0_16, %c0_17], %22 {strides = array<i32>} : memref<8x1xf32, #tpu.memory_space<vmem>>, vector<8x1xf32>,
    return
  }
  func.func @transform_0(%arg0: i32) -> (i32, i32) {
    %c0_i32 = arith.constant 0 : i32
    %c0_i32_0 = arith.constant 0 : i32
    return %arg0, %c0_i32 : i32, i32
  }
  func.func @transform_1(%arg0: i32) -> (i32, i32) {
    %c0_i32 = arith.constant 0 : i32
    %c0_i32_0 = arith.constant 0 : i32
    %c0_i32_1 = arith.constant 0 : i32
    return %c0_i32, %c0_i32_0 : i32, i32
  }
  func.func @transform_2(%arg0: i32) -> (i32, i32) {
    %c0_i32 = arith.constant 0 : i32
    %c0_i32_0 = arith.constant 0 : i32
    %c0_i32_1 = arith.constant 0 : i32
    return %c0_i32, %c0_i32_0 : i32, i32
  }
  func.func @transform_3(%arg0: i32) -> (i32, i32) {
    %c0_i32 = arith.constant 0 : i32
    %c0_i32_0 = arith.constant 0 : i32
    %c0_i32_1 = arith.constant 0 : i32
    return %c0_i32, %c0_i32_0 : i32, i32
  }
  func.func @transform_4(%arg0: i32) -> (i32, i32) {
    %c0_i32 = arith.constant 0 : i32
    %c0_i32_0 = arith.constant 0 : i32
    %c0_i32_1 = arith.constant 0 : i32
    return %c0_i32, %c0_i32_0 : i32, i32
  }
  func.func @transform_5(%arg0: i32) -> (i32, i32) {
    %c0_i32 = arith.constant 0 : i32
    %c0_i32_0 = arith.constant 0 : i32
    %c0_i32_1 = arith.constant 0 : i32
    return %c0_i32, %c0_i32_0 : i32, i32
  }
  func.func @transform_6(%arg0: i32) -> i32 {
    %c0_i32 = arith.constant 0 : i32
    %c0_i32_0 = arith.constant 0 : i32
    return %c0_i32 : i32
  }
  func.func @transform_7(%arg0: i32) -> (i32, i32) {
    %c0_i32 = arith.constant 0 : i32
    %c0_i32_0 = arith.constant 0 : i32
    return %arg0, %c0_i32 : i32, i32
  }
}

</mosaic_0001>

<bundles_post_ra>
// kernel: tpu_custom_call.1
= control target key start
LH: loop header
LB: loop body
LE: loop exit
PB: predicated region body
PF: predicated region fallthrough
CT: control target
= control target key end

     0   :  { %13 = vsyncpa [#allocation4], 0  ;;  %s550_s0 = inlined_call_operand.hbm [shape: f32[8,32], index: 0, kind: input, shape index: {}]   ;;  %s551_s1 = inlined_call_operand.hbm [shape: f32[32,256], index: 1, kind: input, shape index: {}]   ;;  %s552_s2 = inlined_call_operand.vmem [shape: f32[1,256], index: 2, kind: input, shape index: {}]   ;;  %s553_s3 = inlined_call_operand.hbm [shape: f32[256,128], index: 3, kind: input, shape index: {}]   ;;  %s554_s4 = inlined_call_operand.vmem [shape: f32[1,128], index: 4, kind: input, shape index: {}]   ;;  %s555_s5 = inlined_call_operand.vmem [shape: f32[1,128], index: 5, kind: input, shape index: {}]   ;;  %s556_s6 = inlined_call_operand.<no memory space> [shape: f32[1], index: 6, kind: input, shape index: {}]   ;;  %s557_s7 = inlined_call_operand.vmem [shape: f32[8,1], index: 7, kind: output, shape index: {}]  }
   0x1   :  { %14 = vsyncpa [#allocation6], 0  ;;  %s451_s24 = smov [#allocation5]   ;;  %s381_s28 = scalar_lea.hbm %s551_s1, 1024 }
   0x2   :  { %s30_s25 = sshll.u32 %s451_s24, 4  ;;  %p382_p0 = scmp.ne.s32.totalorder %s551_s1, %s381_s28  ;;  %s31_s25 = int_to_ptr.vmem [resolvable:$true] %s30_s25 }
   0x3   :  { %p385_p1 = scmp.lt.u32.totalorder %s381_s28, %s551_s1 }
   0x5   :  { %p387_p2 = pnand %p385_p1, %p382_p0 }
   0x7   :  { %390 = shalt.err (!%p387_p2)
}
   0x8   :  { %s391_s10 = scalar_lea.vmem %s31_s25, 1024  ;;  %p396_p4 = scmp.lt.s32.totalorder %s31_s25, %s31_s25 }
   0x9   :  { %p392_p3 = scmp.ne.s32.totalorder %s31_s25, %s391_s10  ;;  %p397_p5 = scmp.lt.s32.totalorder %s391_s10, %s391_s10 }
   0xb   :  { %p398_p6 = por %p397_p5, %p396_p4 }
   0xd   :  { %p399_p7 = pnand %p398_p6, %p392_p3 }
   0xf   :  { %402 = shalt.err (!%p399_p7)
}
  0x10   :  { %s452_s11 = smov 256   ;;  %s453_s12 = smov 16  }
  0x11   :  { %36 = dma.hbm_to_vmem [thread:$0]  %s551_s1, 1024, %s31_s25, [#allocation6], %s452_s11, %s452_s11, %s453_s12  }
  0x12   :  { %s454_s15 = smov [#allocation3]   ;;  %s455_s17 = smov [#allocation7]  }
  0x13   :  { %s21_s16 = sshll.u32 %s454_s15, 4  ;;  %s44_s18 = sshll.u32 %s455_s17, 4  ;;  %s22_s16 = int_to_ptr.vmem [resolvable:$true] %s21_s16  ;;  %s45_s18 = int_to_ptr.vmem [resolvable:$true] %s44_s18 }
  0x14   :  { %s403_s21 = scalar_lea.hbm %s550_s0, 128 }
  0x15   :  { %p404_p8 = scmp.ne.s32.totalorder %s550_s0, %s403_s21  ;;  %p407_p9 = scmp.lt.u32.totalorder %s403_s21, %s550_s0 }
  0x17   :  { %p409_p10 = pnand %p407_p9, %p404_p8 }
  0x19   :  { %412 = shalt.err (!%p409_p10)
}
  0x1a   :  { %s413_s1 = scalar_lea.vmem %s22_s16, 128  ;;  %p418_p12 = scmp.lt.s32.totalorder %s22_s16, %s22_s16 }
  0x1b   :  { %p414_p11 = scmp.ne.s32.totalorder %s22_s16, %s413_s1  ;;  %p419_p13 = scmp.lt.s32.totalorder %s413_s1, %s413_s1 }
  0x1d   :  { %p420_p0 = por %p419_p13, %p418_p12 }
  0x1f   :  { %p421_p1 = pnand %p420_p0, %p414_p11 }
  0x21   :  { %424 = shalt.err (!%p421_p1)
}
  0x22   :  { %24 = dma.hbm_to_vmem [thread:$0]  %s550_s0, 128, %s22_s16, [#allocation4]  }
  0x23   :  { %s425_s30 = scalar_lea.hbm %s553_s3, 4096 }
  0x24   :  { %p426_p2 = scmp.ne.s32.totalorder %s553_s3, %s425_s30  ;;  %p429_p3 = scmp.lt.u32.totalorder %s425_s30, %s553_s3 }
  0x26   :  { %p431_p4 = pnand %p429_p3, %p426_p2 }
  0x28   :  { %434 = shalt.err (!%p431_p4)
}
  0x29   :  { %s435_s12 = scalar_lea.vmem %s45_s18, 4096  ;;  %p440_p6 = scmp.lt.s32.totalorder %s45_s18, %s45_s18 }
  0x2a   :  { %p436_p5 = scmp.ne.s32.totalorder %s45_s18, %s435_s12  ;;  %p441_p7 = scmp.lt.s32.totalorder %s435_s12, %s435_s12 }
  0x2c   :  { %p442_p8 = por %p441_p7, %p440_p6 }
  0x2e   :  { %p443_p9 = pnand %p442_p8, %p436_p5 }
  0x30   :  { %446 = shalt.err (!%p443_p9)
}
  0x31   :  { %s456_s0 = smov 128   ;;  %s457_s13 = smov 8  }
  0x32   :  { %50 = dma.hbm_to_vmem [thread:$0]  %s553_s3, 4096, %s45_s18, [#allocation6], %s456_s0, %s456_s0, %s457_s13  }
  0x33   :  { %447 = dma.done.wait [#allocation4], 128  }
  0x34   :  { %448 = vsyncadd [#allocation4], 4294967168 }
  0x35   :  { %449 = dma.done.wait [#allocation6], 5120  }
  0x36   :  { %450 = vsyncadd [#allocation6], 4294962176  ;;  %v458_v0 = vmov 0.0   ;;  %v68_v1 = vld [vmem:[#allocation5 + $0x8] sm:$0xff]  ;;  %v70_v2 = vld [vmem:[#allocation5 + $0x18] sm:$0xff]  ;;  %vm87_vm0 = vcmask 261120   ;;  %v77_v62 = vlaneseq }
  0x37   :  { %155 = vmatprep.mubr.f32.mxu0 %v458_v0  ;;  %v67_v3 = vld [vmem:[#allocation5] sm:$0xff]  ;;  %v333_v4 = vpack.c.bf16 %v70_v2, %v68_v1  ;;  %v69_v5 = vld [vmem:[#allocation5 + $0x10] sm:$0xff]  ;;  %v72_v6 = vld [vmem:[#allocation5 + $0x28] sm:$0xff]  ;;  %vm287_vm1 = vcmask 7168  }
  0x38   :  { %v74_v7 = vld [vmem:[#allocation5 + $0x38] sm:$0xff]  ;;  %v335_v8 = vpack.c.bf16 %v69_v5, %v67_v3  ;;  %v71_v10 = vld [vmem:[#allocation5 + $0x20] sm:$0xff]  ;;  %v73_v11 = vld [vmem:[#allocation5 + $0x30] sm:$0xff]  ;;  %v78_v63 = vshrl.u32 %v77_v62, 7 }
  0x39   :  { %v337_v9 = vpack.c.bf16 %v74_v7, %v72_v6  ;;  %334 = vmatprep.subr.bf16.mxu0 %v333_v4  ;;  %v180_v12 = vld [vmem:[#allocation7 + $0x80] sm:$0xff]  ;;  %v181_v13 = vld [vmem:[#allocation7 + $0x88] sm:$0xff]  ;;  %v339_v15 = vpack.c.bf16 %v73_v11, %v71_v10  ;;  %v182_v18 = vld [vmem:[#allocation7 + $0x90] sm:$0xff] }
  0x3a   :  { %v164_v14 = vld [vmem:[#allocation7] sm:$0xff]  ;;  %336 = vmatpush1.bf16.msra.mxu0 %v335_v8  ;;  %v341_v16 = vpack.c.bf16 %v181_v13, %v180_v12  ;;  %v165_v17 = vld [vmem:[#allocation7 + $0x8] sm:$0xff]  ;;  %v183_v19 = vld [vmem:[#allocation7 + $0x98] sm:$0xff]  ;;  %v79_v0 = vsub.s32 0, %v78_v63  ;;  %v83_v2 = vsub.s32 1, %v78_v63 }
  0x3b   :  { %338 = vmatprep.subr.bf16.mxu0 %v337_v9  ;;  %v343_v20 = vpack.c.bf16 %v165_v17, %v164_v14  ;;  %v345_v21 = vpack.c.bf16 %v183_v19, %v182_v18  ;;  %v166_v22 = vld [vmem:[#allocation7 + $0x10] sm:$0xff]  ;;  %v167_v23 = vld [vmem:[#allocation7 + $0x18] sm:$0xff]  ;;  %v184_v24 = vld [vmem:[#allocation7 + $0xa0] sm:$0xff]  ;;  %v285_v19 = vstv %s556_s6 }
  0x3c   :  { %342 = vmatprep.subr.bf16.mxu1 %v341_v16  ;;  %v185_v25 = vld [vmem:[#allocation7 + $0xa8] sm:$0xff]  ;;  %v347_v26 = vpack.c.bf16 %v167_v23, %v166_v22  ;;  %v66_v27 = vld [vmem:[#allocation3] sm:$0xff]  ;;  %v168_v29 = vld [vmem:[#allocation7 + $0x20] sm:$0xff] }
  0x3d   :  { %344 = vmatpush3.bf16.msra.mxu1 %v343_v20  ;;  %v349_v28 = vpack.c.bf16 %v185_v25, %v184_v24  ;;  %v169_v30 = vld [vmem:[#allocation7 + $0x28] sm:$0xff]  ;;  %v186_v31 = vld [vmem:[#allocation7 + $0xb0] sm:$0xff]  ;;  %v187_v32 = vld [vmem:[#allocation7 + $0xb8] sm:$0xff] }
  0x3e   :  { %340 = vmatpush1.bf16.msra.mxu0 %v339_v15  ;;  %346 = vmatprep.subr.bf16.mxu1 %v345_v21  ;;  %v351_v33 = vpack.c.bf16 %v169_v30, %v168_v29  ;;  %v353_v34 = vpack.c.bf16 %v187_v32, %v186_v31  ;;  %v170_v35 = vld [vmem:[#allocation7 + $0x30] sm:$0xff]  ;;  %v171_v36 = vld [vmem:[#allocation7 + $0x38] sm:$0xff]  ;;  %v188_v37 = vld [vmem:[#allocation7 + $0xc0] sm:$0xff] }
  0x3f   :  { %v189_v38 = vld [vmem:[#allocation7 + $0xc8] sm:$0xff]  ;;  %v355_v39 = vpack.c.bf16 %v171_v36, %v170_v35  ;;  %v172_v41 = vld [vmem:[#allocation7 + $0x40] sm:$0xff]  ;;  %v190_v43 = vld [vmem:[#allocation7 + $0xd0] sm:$0xff] }
  0x40   :  { %v357_v40 = vpack.c.bf16 %v189_v38, %v188_v37  ;;  %v173_v42 = vld [vmem:[#allocation7 + $0x48] sm:$0xff]  ;;  %v191_v44 = vld [vmem:[#allocation7 + $0xd8] sm:$0xff]  ;;  %v174_v47 = vld [vmem:[#allocation7 + $0x50] sm:$0xff] }
  0x41   :  { %295 = vmatmul.mubr.msk.f32.vlgmr.msra.gmra.mrb[0].mxu0 %vm87_vm0, %v66_v27  ;;  %348 = vmatpush3.bf16.msra.mxu1 %v347_v26  ;;  %v359_v45 = vpack.c.bf16 %v173_v42, %v172_v41  ;;  %v361_v46 = vpack.c.bf16 %v191_v44, %v190_v43  ;;  %v175_v48 = vld [vmem:[#allocation7 + $0x58] sm:$0xff]  ;;  %v192_v49 = vld [vmem:[#allocation7 + $0xe0] sm:$0xff]  ;;  %v193_v50 = vld [vmem:[#allocation7 + $0xe8] sm:$0xff] }
  0x42   :  { %350 = vmatprep.subr.bf16.mxu1 %v349_v28  ;;  %v363_v51 = vpack.c.bf16 %v175_v48, %v174_v47  ;;  %v365_v52 = vpack.c.bf16 %v193_v50, %v192_v49  ;;  %v176_v53 = vld [vmem:[#allocation7 + $0x60] sm:$0xff]  ;;  %v177_v54 = vld [vmem:[#allocation7 + $0x68] sm:$0xff]  ;;  %v194_v56 = vld [vmem:[#allocation7 + $0xf0] sm:$0xff] }
  0x43   :  { %v367_v55 = vpack.c.bf16 %v177_v54, %v176_v53  ;;  %v195_v57 = vld [vmem:[#allocation7 + $0xf8] sm:$0xff]  ;;  %v178_v59 = vld [vmem:[#allocation7 + $0x70] sm:$0xff] }
  0x44   :  { %v369_v58 = vpack.c.bf16 %v195_v57, %v194_v56  ;;  %v179_v60 = vld [vmem:[#allocation7 + $0x78] sm:$0xff] }
  0x45   :  { %352 = vmatpush3.bf16.msra.mxu1 %v351_v33  ;;  %v371_v61 = vpack.c.bf16 %v179_v60, %v178_v59  ;;  %v75_v1 = vld [vmem:[%s552_s2] sm:$0x3] }
  0x46   :  { %354 = vmatprep.subr.bf16.mxu1 %v353_v34  ;;  %v80_v3 = vrot.slane %v75_v1, %v79_v0  ;;  %v84_v4 = vrot.slane %v75_v1, %v83_v2  ;;  %v296_v13 = vld [vmem:[%s554_s4] ss:$0 sm:$0xff] }
  0x47   :  { %v297_v16 = vld [vmem:[%s555_s5] ss:$0 sm:$0xff] }
  0x49   :  { %356 = vmatpush3.bf16.msra.mxu1 %v355_v39 }
  0x4a   :  { %358 = vmatprep.subr.bf16.mxu1 %v357_v40 }
  0x4d   :  { %360 = vmatpush3.bf16.msra.mxu1 %v359_v45 }
  0x4e   :  { %362 = vmatprep.subr.bf16.mxu1 %v361_v46 }
  0x51   :  { %364 = vmatpush3.bf16.msra.mxu1 %v363_v51 }
  0x52   :  { %366 = vmatprep.subr.bf16.mxu1 %v365_v52 }
  0x55   :  { %368 = vmatpush3.bf16.msra.mxu1 %v367_v55 }
  0x56   :  { %370 = vmatprep.subr.bf16.mxu1 %v369_v58 }
  0x59   :  { %372 = vmatpush3.bf16.msra.mxu1 %v371_v61 }
 0x114   :  { %v157_v5 = vpop.f32.mrb[0].mxu0 }
 0x115   :  { %v158_v6 = vadd.f32 %v157_v5, %v80_v3  ;;  %v159_v7 = vpop.f32.mrb[1].mxu0 }
 0x116   :  { %v160_v8 = vadd.f32 %v159_v7, %v84_v4 }
 0x117   :  { %v162_v10 = vmax.f32 %v158_v6, 0.0 }
 0x118   :  { %v163_v9 = vmax.f32 %v160_v8, 0.0 }
 0x11a   :  { %267 = vmatprep.mubr.f32.mxu1 %v163_v9 }
 0x11b   :  { %268 = vmatmul.mubr.f32.vlgmr.msra.gmra.mrb[0].mxu1 %v162_v10 }
 0x1ee   :  { %v330_v11 = vpop.f32.mrb[0].mxu1 }
 0x1ef   :  { %v331_v12 = vpop.f32.mrb[1].mxu1 }
 0x1f0   :  { %v332_v14 = vadd.f32 %v331_v12, %v330_v11 }
 0x1f2   :  { %v270_v15 = vadd.f32 %v332_v14, %v296_v13 }
 0x1f4   :  { %v273_v17 = vmax.f32 %v270_v15, 0.0 }
 0x1f6   :  { %v281_v18 = vmul.f32 %v297_v16, %v273_v17 }
 0x1f8   :  { %282 = vadd.xlane.f32.xlu0 %v281_v18 }
 0x285   :  { %v283_v20 = vpop.xlane.xlu0 %282 }
 0x286   :  { %v286_v21 = vadd.f32 %v285_v19, %v283_v20 }
 0x288   :  { %288 = vst.msk [vmem:[%s557_s7] sm:$0xff] %vm287_vm1, %v286_v21 }
 0x289   :  { %293 = vsyncpa [#allocation4], 1 }
 0x28a   :  { %294 = vsyncpa [#allocation6], 1 }

</bundles_post_ra>
